<compile_context>
chip_gen: v5e
topology: v5e:2x2
jax: 0.10.0
libtpu: 0.0.40
codegen_flags: <defaults>
</compile_context>

<pallas_src>
import functools

import jax
import jax.numpy as jnp
from jax.experimental import pallas as pl
from jax.experimental.pallas import tpu as pltpu


def _round_up(x: int, m: int) -> int:
    return (x + m - 1) // m * m


def _mlp_kernel(x_ref, w1_ref, b1_ref, mask_ref, w2_ref, b2_ref, out_ref, *,
                apply_softmax: bool, out_valid: int):
    # fc1 (MXU, bf16 operands, f32 accumulate) + bias + ReLU (f32 on VPU)
    x = x_ref[...].astype(jnp.bfloat16)
    h = jnp.dot(x, w1_ref[...], preferred_element_type=jnp.float32)
    h = jnp.maximum(h + b1_ref[...], 0.0)                 # (TB, Hp) + (1, Hp)

    # dropout: mask values are 0 or 1/(1-p), precomputed in the wrapper
    h = h * mask_ref[...]

    # fc2
    out = jnp.dot(h.astype(jnp.bfloat16), w2_ref[...],
                  preferred_element_type=jnp.float32)
    out = out + b2_ref[...]                               # (TB, Op) + (1, Op)

    if apply_softmax:
        # softmax over the real output columns only (lanes >= out_valid are padding)
        col = jax.lax.broadcasted_iota(jnp.int32, out.shape, 1)
        out = jnp.where(col < out_valid, out, -jnp.inf)
        m = jnp.max(out, axis=-1, keepdims=True)
        e = jnp.exp(out - m)                               # exp(-inf) -> 0 on padded lanes
        out = e / jnp.sum(e, axis=-1, keepdims=True)

    out_ref[...] = out.astype(out_ref.dtype)


def mlp_forward(x, w1, b1, w2, b2, *, dropout_key, apply_softmax=False, dropout_p=0.5):
    """x: (B, input_dim); w1: (input_dim, hidden); b1: (hidden,);
    w2: (hidden, output_dim); b2: (output_dim,). Weights are pre-transposed
    (in_features, out_features) so the kernel does plain row-major dots."""
    B, K = x.shape
    H = w1.shape[1]
    O = w2.shape[1]

    # Lane-dense padding (last dims multiples of 128) and batch tiling.
    K_pad = _round_up(K, 128)
    H_pad = _round_up(H, 128)
    O_pad = _round_up(O, 128)
    TILE_B = min(256, _round_up(B, 8))
    B_pad = _round_up(B, TILE_B)

    xp = jnp.zeros((B_pad, K_pad), jnp.float32).at[:B, :K].set(x.astype(jnp.float32))
    w1p = jnp.zeros((K_pad, H_pad), jnp.bfloat16).at[:K, :H].set(w1.astype(jnp.bfloat16))
    b1p = jnp.zeros((1, H_pad), jnp.float32).at[0, :H].set(b1.astype(jnp.float32))
    w2p = jnp.zeros((H_pad, O_pad), jnp.bfloat16).at[:H, :O].set(w2.astype(jnp.bfloat16))
    b2p = jnp.zeros((1, O_pad), jnp.float32).at[0, :O].set(b2.astype(jnp.float32))

    # F.dropout defaults to training=True, so dropout is always applied.
    if dropout_p > 0.0:
        keep = jax.random.bernoulli(dropout_key, 1.0 - dropout_p, (B_pad, H_pad))
        mask = keep.astype(jnp.float32) * (1.0 / (1.0 - dropout_p))
    else:
        mask = jnp.ones((B_pad, H_pad), jnp.float32)

    kernel = functools.partial(_mlp_kernel,
                               apply_softmax=apply_softmax,
                               out_valid=O)

    grid = (B_pad // TILE_B,)
    out = pl.pallas_call(
        kernel,
        out_shape=jax.ShapeDtypeStruct((B_pad, O_pad), jnp.float32),
        grid_spec=pltpu.PrefetchScalarGridSpec(
            num_scalar_prefetch=0,
            grid=grid,
            in_specs=[
                pl.BlockSpec((TILE_B, K_pad), lambda i: (i, 0)),   # x    (tiled over batch)
                pl.BlockSpec((K_pad, H_pad), lambda i: (0, 0)),    # w1   (resident)
                pl.BlockSpec((1, H_pad), lambda i: (0, 0)),        # b1   (resident)
                pl.BlockSpec((TILE_B, H_pad), lambda i: (i, 0)),   # mask (tiled over batch)
                pl.BlockSpec((H_pad, O_pad), lambda i: (0, 0)),    # w2   (resident)
                pl.BlockSpec((1, O_pad), lambda i: (0, 0)),        # b2   (resident)
            ],
            out_specs=pl.BlockSpec((TILE_B, O_pad), lambda i: (i, 0)),
        ),
        compiler_params=pltpu.CompilerParams(
            dimension_semantics=("parallel",),
            vmem_limit_bytes=64 * 1024 * 1024,   # sized for v7x's 64 MiB physical VMEM
        ),
    )(xp, w1p, b1p, mask, w2p, b2p)

    out = out[:B, :O].astype(x.dtype)
    # .squeeze(): remove all size-1 dims (matches torch.Tensor.squeeze()).
    return jnp.squeeze(out)


def init_params(key, input_dim, hidden_dim, output_dim, dtype=jnp.float32):
    """Deterministic init mimicking nn.Linear's U(-1/sqrt(fan_in), 1/sqrt(fan_in))."""
    k1, k2, k3, k4 = jax.random.split(key, 4)
    lim1 = 1.0 / (input_dim ** 0.5)
    lim2 = 1.0 / (hidden_dim ** 0.5)
    w1 = jax.random.uniform(k1, (input_dim, hidden_dim), dtype, -lim1, lim1)
    b1 = jax.random.uniform(k2, (hidden_dim,), dtype, -lim1, lim1)
    w2 = jax.random.uniform(k3, (hidden_dim, output_dim), dtype, -lim2, lim2)
    b2 = jax.random.uniform(k4, (output_dim,), dtype, -lim2, lim2)
    return w1, b1, w2, b2


if __name__ == "__main__":
    key = jax.random.PRNGKey(0)
    k_x, k_p, k_d = jax.random.split(key, 3)

    batch, input_dim, hidden_dim, output_dim = 8, 32, 64, 16

    x = jax.random.normal(k_x, (batch, input_dim), dtype=jnp.float32)
    w1, b1, w2, b2 = init_params(k_p, input_dim, hidden_dim, output_dim)

    out = mlp_forward(x, w1, b1, w2, b2, dropout_key=k_d, apply_softmax=False)
    out = jax.block_until_ready(out)
    assert out.shape == (batch, output_dim)
    assert bool(jnp.all(jnp.isfinite(out)))

    out_sm = mlp_forward(x, w1, b1, w2, b2, dropout_key=k_d, apply_softmax=True)
    out_sm = jax.block_until_ready(out_sm)
    assert out_sm.shape == (batch, output_dim)
    assert bool(jnp.allclose(jnp.sum(out_sm, axis=-1), 1.0, atol=1e-3))

    print("KERNEL_OK")
</pallas_src>

<mosaic_0001>
module attributes {stable_mosaic.version = 11 : i64} {
  func.func @_mlp_kernel(%arg0: i32, %arg1: memref<8x128xf32, #tpu.memory_space<vmem>>, %arg2: memref<128x128xbf16, #tpu.memory_space<vmem>>, %arg3: memref<1x128xf32, #tpu.memory_space<vmem>>, %arg4: memref<8x128xf32, #tpu.memory_space<vmem>>, %arg5: memref<128x128xbf16, #tpu.memory_space<vmem>>, %arg6: memref<1x128xf32, #tpu.memory_space<vmem>>, %arg7: memref<8x128xf32, #tpu.memory_space<vmem>>) attributes {dimension_semantics = [#tpu.dimension_semantics<parallel>], iteration_bounds = array<i64: 1>, scalar_prefetch = 0 : i64, scratch_operands = 0 : i64, tpu.core_type = #tpu.core_type<tc>, window_params = [{transform_indices = @transform_0, window_bounds = array<i64: 8, 128>}, {pipeline_mode = #tpu.pipeline_mode<synchronous>, transform_indices = @transform_1, window_bounds = array<i64: 128, 128>}, {pipeline_mode = #tpu.pipeline_mode<synchronous>, transform_indices = @transform_2, window_bounds = array<i64: 1, 128>}, {transform_indices = @transform_3, window_bounds = array<i64: 8, 128>}, {pipeline_mode = #tpu.pipeline_mode<synchronous>, transform_indices = @transform_4, window_bounds = array<i64: 128, 128>}, {pipeline_mode = #tpu.pipeline_mode<synchronous>, transform_indices = @transform_5, window_bounds = array<i64: 1, 128>}, {transform_indices = @transform_6, window_bounds = array<i64: 8, 128>}]} {
    %c0 = arith.constant 0 : index
    %c0_0 = arith.constant 0 : index
    %0 = vector.load %arg1[%c0, %c0_0] : memref<8x128xf32, #tpu.memory_space<vmem>>, vector<8x128xf32>
    %1 = arith.truncf %0 : vector<8x128xf32> to vector<8x128xbf16>
    %c0_1 = arith.constant 0 : index
    %c0_2 = arith.constant 0 : index
    %2 = vector.load %arg2[%c0_1, %c0_2] : memref<128x128xbf16, #tpu.memory_space<vmem>>, vector<128x128xbf16>
    %cst = arith.constant dense<0.000000e+00> : vector<8x128xf32>
    %3 = tpu.matmul %1, %2, %cst {dimension_numbers = #tpu.dot_dimension_numbers<[1], [0], [0], [1], [0, 0, 1, 1], [], []>} : vector<8x128xbf16>, vector<128x128xbf16>, vector<8x128xf32> -> vector<8x128xf32>
    %c0_3 = arith.constant 0 : index
    %c0_4 = arith.constant 0 : index
    %4 = vector.load %arg3[%c0_3, %c0_4] : memref<1x128xf32, #tpu.memory_space<vmem>>, vector<1x128xf32>
    %5 = vector.broadcast %4 : vector<1x128xf32> to vector<8x128xf32>
    %6 = arith.addf %3, %5 : vector<8x128xf32>
    %cst_5 = arith.constant 0.000000e+00 : f32
    %7 = vector.broadcast %cst_5 : f32 to vector<8x128xf32>
    %8 = arith.maximumf %6, %7 : vector<8x128xf32>
    %c0_6 = arith.constant 0 : index
    %c0_7 = arith.constant 0 : index
    %9 = vector.load %arg4[%c0_6, %c0_7] : memref<8x128xf32, #tpu.memory_space<vmem>>, vector<8x128xf32>
    %10 = arith.mulf %8, %9 : vector<8x128xf32>
    %11 = arith.truncf %10 : vector<8x128xf32> to vector<8x128xbf16>
    %c0_8 = arith.constant 0 : index
    %c0_9 = arith.constant 0 : index
    %12 = vector.load %arg5[%c0_8, %c0_9] : memref<128x128xbf16, #tpu.memory_space<vmem>>, vector<128x128xbf16>
    %cst_10 = arith.constant dense<0.000000e+00> : vector<8x128xf32>
    %13 = tpu.matmul %11, %12, %cst_10 {dimension_numbers = #tpu.dot_dimension_numbers<[1], [0], [0], [1], [0, 0, 1, 1], [], []>} : vector<8x128xbf16>, vector<128x128xbf16>, vector<8x128xf32> -> vector<8x128xf32>
    %c0_11 = arith.constant 0 : index
    %c0_12 = arith.constant 0 : index
    %14 = vector.load %arg6[%c0_11, %c0_12] : memref<1x128xf32, #tpu.memory_space<vmem>>, vector<1x128xf32>
    %15 = vector.broadcast %14 : vector<1x128xf32> to vector<8x128xf32>
    %16 = arith.addf %13, %15 : vector<8x128xf32>
    %c0_13 = arith.constant 0 : index
    %c0_14 = arith.constant 0 : index
    %17 = vector.load %arg7[%c0_13, %c0_14] : memref<8x128xf32, #tpu.memory_space<vmem>>, vector<8x128xf32>
    tpu.vector_store %arg7[%c0_13, %c0_14], %16 {strides = array<i32>} : memref<8x128xf32, #tpu.memory_space<vmem>>, vector<8x128xf32>,
    return
  }
  func.func @transform_0(%arg0: i32) -> (i32, i32) {
    %c0_i32 = arith.constant 0 : i32
    %c0_i32_0 = arith.constant 0 : i32
    return %arg0, %c0_i32 : i32, i32
  }
  func.func @transform_1(%arg0: i32) -> (i32, i32) {
    %c0_i32 = arith.constant 0 : i32
    %c0_i32_0 = arith.constant 0 : i32
    %c0_i32_1 = arith.constant 0 : i32
    return %c0_i32, %c0_i32_0 : i32, i32
  }
  func.func @transform_2(%arg0: i32) -> (i32, i32) {
    %c0_i32 = arith.constant 0 : i32
    %c0_i32_0 = arith.constant 0 : i32
    %c0_i32_1 = arith.constant 0 : i32
    return %c0_i32, %c0_i32_0 : i32, i32
  }
  func.func @transform_3(%arg0: i32) -> (i32, i32) {
    %c0_i32 = arith.constant 0 : i32
    %c0_i32_0 = arith.constant 0 : i32
    return %arg0, %c0_i32 : i32, i32
  }
  func.func @transform_4(%arg0: i32) -> (i32, i32) {
    %c0_i32 = arith.constant 0 : i32
    %c0_i32_0 = arith.constant 0 : i32
    %c0_i32_1 = arith.constant 0 : i32
    return %c0_i32, %c0_i32_0 : i32, i32
  }
  func.func @transform_5(%arg0: i32) -> (i32, i32) {
    %c0_i32 = arith.constant 0 : i32
    %c0_i32_0 = arith.constant 0 : i32
    %c0_i32_1 = arith.constant 0 : i32
    return %c0_i32, %c0_i32_0 : i32, i32
  }
  func.func @transform_6(%arg0: i32) -> (i32, i32) {
    %c0_i32 = arith.constant 0 : i32
    %c0_i32_0 = arith.constant 0 : i32
    return %arg0, %c0_i32 : i32, i32
  }
}

</mosaic_0001>

<bundles_post_ra>
// kernel: tpu_custom_call.1
= control target key start
LH: loop header
LB: loop body
LE: loop exit
PB: predicated region body
PF: predicated region fallthrough
CT: control target
= control target key end

     0   :  { %11 = vsyncpa [#allocation3], 0  ;;  %s551_s0 = inlined_call_operand.hbm [shape: f32[8,128], index: 0, kind: input, shape index: {}]   ;;  %s552_s1 = inlined_call_operand.hbm [shape: bf16[128,128], index: 1, kind: input, shape index: {}]   ;;  %s553_s2 = inlined_call_operand.vmem [shape: f32[1,128], index: 2, kind: input, shape index: {}]   ;;  %s554_s3 = inlined_call_operand.hbm [shape: f32[8,128], index: 3, kind: input, shape index: {}]   ;;  %s555_s4 = inlined_call_operand.hbm [shape: bf16[128,128], index: 4, kind: input, shape index: {}]   ;;  %s556_s5 = inlined_call_operand.vmem [shape: f32[1,128], index: 5, kind: input, shape index: {}]   ;;  %s557_s6 = inlined_call_operand.hbm [shape: f32[8,128], index: 6, kind: output, shape index: {}]  }
   0x1   :  { %12 = vsyncpa [#allocation6], 0 }
   0x2   :  { %13 = vsyncpa [#allocation9], 0  ;;  %s30_s23 = sshll.u32 %s552_s1, 4  ;;  %s31_s23 = int_to_ptr.hbm [resolvable:$true] %s30_s23 }
   0x3   :  { %14 = vsyncpa [#allocation4], 0  ;;  %s488_s24 = smov [#allocation5]   ;;  %s20_s28 = sshll.u32 %s551_s0, 4  ;;  %s21_s28 = int_to_ptr.hbm [resolvable:$true] %s20_s28 }
   0x4   :  { %s32_s25 = sshll.u32 %s488_s24, 4  ;;  %s489_s29 = smov 64   ;;  %s33_s25 = int_to_ptr.vmem [resolvable:$true] %s32_s25 }
   0x5   :  { %s490_s30 = smov 4   ;;  %s491_s7 = smov [#allocation2]  }
   0x6   :  { %38 = dma.hbm_to_vmem [thread:$0]  %s31_s23, 1024, %s33_s25, [#allocation6], %s489_s29, %s489_s29, %s490_s30  }
   0x7   :  { %s22_s8 = sshll.u32 %s491_s7, 4  ;;  %s46_s11 = sshll.u32 %s554_s3, 4  ;;  %s23_s8 = int_to_ptr.vmem [resolvable:$true] %s22_s8  ;;  %s47_s11 = int_to_ptr.hbm [resolvable:$true] %s46_s11 }
   0x8   :  { %25 = dma.hbm_to_vmem [thread:$0]  %s21_s28, 128, %s23_s8, [#allocation3]  }
   0x9   :  { %s56_s13 = sshll.u32 %s555_s4, 4  ;;  %s492_s14 = smov [#allocation7]   ;;  %s57_s13 = int_to_ptr.hbm [resolvable:$true] %s56_s13 }
   0xa   :  { %s48_s15 = sshll.u32 %s492_s14, 4  ;;  %s493_s0 = smov [#allocation8]   ;;  %s49_s15 = int_to_ptr.vmem [resolvable:$true] %s48_s15 }
   0xb   :  { %51 = dma.hbm_to_vmem [thread:$0]  %s47_s11, 128, %s49_s15, [#allocation6]  }
   0xc   :  { %s58_s16 = sshll.u32 %s493_s0, 4  ;;  %s59_s16 = int_to_ptr.vmem [resolvable:$true] %s58_s16 }
   0xd   :  { %64 = dma.hbm_to_vmem [thread:$0]  %s57_s13, 1024, %s59_s16, [#allocation9], %s489_s29, %s489_s29, %s490_s30  }
   0xe   :  { %480 = dma.done.wait [#allocation3], 128  }
   0xf   :  { %481 = vsyncadd [#allocation3], 4294967168 }
  0x10   :  { %482 = dma.done.wait [#allocation6], 1152  }
  0x11   :  { %483 = vsyncadd [#allocation6], 4294966144 }
  0x12   :  { %484 = dma.done.wait [#allocation9], 1024  }
  0x13   :  { %485 = vsyncadd [#allocation9], 4294966272  ;;  %v342_v0 = vld [vmem:[#allocation5 + $0x38] sm:$0xff]  ;;  %v341_v1 = vld [vmem:[#allocation5 + $0x30] sm:$0xff]  ;;  %s494_s19 = smov [#allocation10]   ;;  %s259_s23 = sshll.u32 %s557_s6, 4  ;;  %s260_s23 = int_to_ptr.hbm [resolvable:$true] %s259_s23 }
  0x14   :  { %153 = vmatpush.bf16.msra.mxu0 %v342_v0  ;;  %v350_v2 = vld [vmem:[#allocation8 + $0x38] sm:$0xff]  ;;  %v349_v3 = vld [vmem:[#allocation8 + $0x30] sm:$0xff]  ;;  %v340_v4 = vld [vmem:[#allocation5 + $0x28] sm:$0xff]  ;;  %s257_s20 = sshll.u32 %s494_s19, 4  ;;  %s258_s20 = int_to_ptr.vmem [resolvable:$true] %s257_s20 }
  0x15   :  { %238 = vmatpush.bf16.msra.mxu1 %v350_v2  ;;  %v348_v5 = vld [vmem:[#allocation8 + $0x28] sm:$0xff]  ;;  %v339_v6 = vld [vmem:[#allocation5 + $0x20] sm:$0xff]  ;;  %v347_v7 = vld [vmem:[#allocation8 + $0x20] sm:$0xff] }
  0x16   :  { %v338_v8 = vld [vmem:[#allocation5 + $0x18] sm:$0xff]  ;;  %v346_v9 = vld [vmem:[#allocation8 + $0x18] sm:$0xff]  ;;  %v337_v10 = vld [vmem:[#allocation5 + $0x10] sm:$0xff] }
  0x17   :  { %v345_v11 = vld [vmem:[#allocation8 + $0x10] sm:$0xff]  ;;  %v336_v12 = vld [vmem:[#allocation5 + $0x8] sm:$0xff]  ;;  %v335_v13 = vld [vmem:[#allocation5] sm:$0xff] }
  0x18   :  { %154 = vmatpush.bf16.msra.mxu0 %v341_v1  ;;  %v83_v14 = vld [vmem:[#allocation2] sm:$0xff]  ;;  %v344_v16 = vld [vmem:[#allocation8 + $0x8] sm:$0xff]  ;;  %v343_v17 = vld [vmem:[#allocation8] sm:$0xff] }
  0x19   :  { %239 = vmatpush.bf16.msra.mxu1 %v349_v3  ;;  %v84_v15 = vpack.c.bf16 %v83_v14, %v83_v14  ;;  %v358_v18 = vld [vmem:[%s553_s2] ss:$0 sm:$0xff]  ;;  %v167_v21 = vld [vmem:[#allocation7] sm:$0xff] }
  0x1a   :  { %v359_v26 = vld [vmem:[%s556_s5] ss:$0 sm:$0xff] }
  0x1c   :  { %155 = vmatpush.bf16.msra.mxu0 %v340_v4 }
  0x1d   :  { %240 = vmatpush.bf16.msra.mxu1 %v348_v5 }
  0x20   :  { %156 = vmatpush.bf16.msra.mxu0 %v339_v6 }
  0x21   :  { %241 = vmatpush.bf16.msra.mxu1 %v347_v7 }
  0x24   :  { %157 = vmatpush.bf16.msra.mxu0 %v338_v8 }
  0x25   :  { %242 = vmatpush.bf16.msra.mxu1 %v346_v9 }
  0x28   :  { %158 = vmatpush.bf16.msra.mxu0 %v337_v10 }
  0x29   :  { %243 = vmatpush.bf16.msra.mxu1 %v345_v11 }
  0x2c   :  { %159 = vmatpush.bf16.msra.mxu0 %v336_v12 }
  0x2d   :  { %244 = vmatpush.bf16.msra.mxu1 %v344_v16 }
  0x30   :  { %160 = vmatpush.bf16.msra.mxu0 %v335_v13 }
  0x31   :  { %245 = vmatpush.bf16.msra.mxu1 %v343_v17 }
  0x33   :  { %161 = vmatmul.bf16.vlgmr.msra.gmra.mxu0 %v84_v15 }
  0xb0   :  { %v162_v19 = vpop.f32.mrf.mxu0 }
  0xb1   :  { %v163_v20 = vadd.f32 %v358_v18, %v162_v19 }
  0xb3   :  { %v166_v22 = vmax.f32 %v163_v20, 0.0 }
  0xb5   :  { %v168_v23 = vmul.f32 %v167_v21, %v166_v22 }
  0xb7   :  { %v169_v24 = vpack.c.bf16 %v168_v23, %v168_v23 }
  0xb8   :  { %v164_v25 = vpop.f32.mrf.mxu0 }
  0xb9   :  { %246 = vmatmul.bf16.vlgmr.msra.gmra.mxu1 %v169_v24 }
 0x136   :  { %v247_v27 = vpop.f32.mrf.mxu1 }
 0x137   :  { %v248_v28 = vadd.f32 %v359_v26, %v247_v27 }
 0x139   :  { %251 = vst [vmem:[#allocation10] sm:$0xff] %v248_v28 }
 0x13a   :  { %262 = dma.vmem_to_hbm [thread:$0]  %s258_s20, 128, %s260_s23, [#allocation4]  }
 0x13e   :  { %v249_v29 = vpop.f32.mrf.mxu1 }
 0x13f   :  { %486 = dma.done.wait [#allocation4], 128  }
 0x140   :  { %487 = vsyncadd [#allocation4], 4294967168 }
 0x141   :  { %267 = vsyncpa [#allocation3], 1 }
 0x142   :  { %268 = vsyncpa [#allocation6], 1 }
 0x143   :  { %269 = vsyncpa [#allocation9], 1 }
 0x144   :  { %270 = vsyncpa [#allocation4], 1 }

</bundles_post_ra>
